<compile_context>
chip_gen: v7x
topology: tpu7x:2x2x1
jax: 0.10.0
libtpu: 0.0.40
codegen_flags: <defaults>
</compile_context>

<pallas_src>
import jax
import jax.numpy as jnp
from jax.experimental import pallas as pl
from jax.experimental.pallas import tpu as pltpu


def ffn_cls_kernel(x_ref, w1_ref, b1_ref, w2_ref, b2_ref, o_ref):
    # x_ref : (tm, 768)  f32   CLS embeddings (columns 0:768 of the (B, S*D) view)
    # w1_ref: (768, 512) bf16  (in, out) layout, i.e. torch weight transposed
    # b1_ref: (1, 512)   f32
    # w2_ref: (1, 512)   f32   torch nn.Linear(512, 1).weight layout (out, in)
    # b2_ref: (1, 1)     f32
    # o_ref : (tm, 1)    f32
    x = x_ref[...].astype(jnp.bfloat16)               # MXU-native operand
    h = jnp.dot(x, w1_ref[...], preferred_element_type=jnp.float32)
    h = jnp.maximum(h + b1_ref[...], 0.0)             # bias + ReLU (VPU)
    # Second linear (512 -> 1) as a lane reduction instead of an N=1 matmul:
    # the cross-lane reduce lands on the otherwise-idle XLU slot.
    out = jnp.sum(h * w2_ref[...], axis=-1, keepdims=True) + b2_ref[...]
    o_ref[...] = out.astype(o_ref.dtype)


def transformer_encoder_with_fnn_forward(last_hidden_state, attention_mask,
                                         w1_bf16, b1, w2_row, b2,
                                         *, block_rows=512):
    # attention_mask is consumed by the (synthetic) BERT backbone only.
    del attention_mask
    B, S, D_in = last_hidden_state.shape
    D_hid = w1_bf16.shape[1]
    D_out = w2_row.shape[0]

    # Free reshape (contiguous, row-major -> bitcast).  Column block 0 of the
    # (B, S*D_in) view is exactly last_hidden_state[:, 0, :], so the BlockSpec
    # DMAs only the CLS rows (B * D_in elements), not the whole sequence.
    x2d = last_hidden_state.reshape(B, S * D_in)

    # Small-B: single block (block shape == full dim is always legal).
    # Large-B: tile rows in multiples of 8 and shard the batch axis across
    # TensorCores ("parallel"); weights stay on constant index_maps.
    if B <= block_rows or B % block_rows != 0:
        tm = B
        grid = (1,)
        semantics = ("arbitrary",)
    else:
        tm = block_rows                       # multiple of 8 by construction
        grid = (B // tm,)
        semantics = ("parallel",)

    flops = 2 * B * D_in * D_hid + 2 * B * D_hid
    bytes_accessed = (w1_bf16.size * 2 + b1.size * 4 + w2_row.size * 4
                      + b2.size * 4 + B * D_in * 4 + B * D_out * 4)

    return pl.pallas_call(
        ffn_cls_kernel,
        out_shape=jax.ShapeDtypeStruct((B, D_out), last_hidden_state.dtype),
        grid_spec=pltpu.PrefetchScalarGridSpec(
            num_scalar_prefetch=0,
            grid=grid,
            in_specs=[
                pl.BlockSpec((tm, D_in), lambda i: (i, 0)),      # CLS slab only
                pl.BlockSpec((D_in, D_hid), lambda i: (0, 0)),   # w1 (bf16)
                pl.BlockSpec((1, D_hid), lambda i: (0, 0)),      # b1
                pl.BlockSpec((1, D_hid), lambda i: (0, 0)),      # w2 row
                pl.BlockSpec((1, D_out), lambda i: (0, 0)),      # b2
            ],
            out_specs=pl.BlockSpec((tm, D_out), lambda i: (i, 0)),
        ),
        compiler_params=pltpu.CompilerParams(
            dimension_semantics=semantics),
        cost_estimate=pl.CostEstimate(
            flops=flops, transcendentals=0, bytes_accessed=bytes_accessed),
    )(x2d, w1_bf16, b1, w2_row, b2)


if __name__ == "__main__":
    key = jax.random.PRNGKey(0)
    k_x, k_w1, k_b1, k_w2, k_b2 = jax.random.split(key, 5)

    B, S, D_IN, D_HID, D_OUT = 2, 8, 768, 512, 1

    # Synthetic BERT last_hidden_state (stands in for outputs.last_hidden_state)
    last_hidden_state = jax.random.normal(k_x, (B, S, D_IN), dtype=jnp.float32)
    attention_mask = jnp.ones((B, S), dtype=jnp.int32)

    # Deterministic FFN parameter init.
    #   torch nn.Linear(768, 512).weight is (512, 768); the kernel takes the
    #   transpose (in, out).  torch nn.Linear(512, 1).weight is (1, 512); the
    #   kernel consumes that row layout directly.
    lim1 = 1.0 / (D_IN ** 0.5)
    lim2 = 1.0 / (D_HID ** 0.5)
    w1 = jax.random.uniform(k_w1, (D_IN, D_HID), jnp.float32, -lim1, lim1)
    b1 = jax.random.uniform(k_b1, (1, D_HID), jnp.float32, -lim1, lim1)
    w2_row = jax.random.uniform(k_w2, (D_OUT, D_HID), jnp.float32, -lim2, lim2)
    b2 = jax.random.uniform(k_b2, (1, D_OUT), jnp.float32, -lim2, lim2)

    # Store the big weight in bf16: halves the dominant HBM transfer and is
    # MXU-native on every generation (incl. v7x, which has no int MXU mode).
    w1_bf16 = w1.astype(jnp.bfloat16)

    out = transformer_encoder_with_fnn_forward(
        last_hidden_state, attention_mask, w1_bf16, b1, w2_row, b2)
    out = jax.block_until_ready(out)

    # Pure-JAX reference with matching precision (bf16 operands into the first
    # matmul, f32 accumulation and f32 everywhere else).
    cls = last_hidden_state[:, 0, :]
    h_ref = jnp.dot(cls.astype(jnp.bfloat16), w1_bf16,
                    preferred_element_type=jnp.float32)
    h_ref = jnp.maximum(h_ref + b1, 0.0)
    ref = jnp.sum(h_ref * w2_row, axis=-1, keepdims=True) + b2

    assert out.shape == (B, D_OUT)
    assert jnp.allclose(out, ref, atol=1e-2, rtol=1e-2)

    print("KERNEL_OK")
</pallas_src>

<mosaic_0001>
module attributes {stable_mosaic.version = 11 : i64} {
  func.func @ffn_cls_kernel(%arg0: i32, %arg1: memref<2x768xf32, #tpu.memory_space<vmem>>, %arg2: memref<768x512xbf16, #tpu.memory_space<vmem>>, %arg3: memref<1x512xf32, #tpu.memory_space<vmem>>, %arg4: memref<1x512xf32, #tpu.memory_space<vmem>>, %arg5: memref<1x1xf32, #tpu.memory_space<vmem>>, %arg6: memref<2x1xf32, #tpu.memory_space<vmem>>) attributes {dimension_semantics = [#tpu.dimension_semantics<arbitrary>], iteration_bounds = array<i64: 1>, scalar_prefetch = 0 : i64, scratch_operands = 0 : i64, tpu.core_type = #tpu.core_type<tc>, window_params = [{transform_indices = @transform_0, window_bounds = array<i64: 2, 768>}, {pipeline_mode = #tpu.pipeline_mode<synchronous>, transform_indices = @transform_1, window_bounds = array<i64: 768, 512>}, {pipeline_mode = #tpu.pipeline_mode<synchronous>, transform_indices = @transform_2, window_bounds = array<i64: 1, 512>}, {pipeline_mode = #tpu.pipeline_mode<synchronous>, transform_indices = @transform_3, window_bounds = array<i64: 1, 512>}, {pipeline_mode = #tpu.pipeline_mode<synchronous>, transform_indices = @transform_4, window_bounds = array<i64: 1, 1>}, {transform_indices = @transform_5, window_bounds = array<i64: 2, 1>}]} {
    %c0 = arith.constant 0 : index
    %c0_0 = arith.constant 0 : index
    %0 = vector.load %arg1[%c0, %c0_0] : memref<2x768xf32, #tpu.memory_space<vmem>>, vector<2x768xf32>
    %1 = arith.truncf %0 : vector<2x768xf32> to vector<2x768xbf16>
    %c0_1 = arith.constant 0 : index
    %c0_2 = arith.constant 0 : index
    %2 = vector.load %arg2[%c0_1, %c0_2] : memref<768x512xbf16, #tpu.memory_space<vmem>>, vector<768x512xbf16>
    %cst = arith.constant dense<0.000000e+00> : vector<2x512xf32>
    %3 = tpu.matmul %1, %2, %cst {dimension_numbers = #tpu.dot_dimension_numbers<[1], [0], [0], [1], [0, 0, 1, 1], [], []>} : vector<2x768xbf16>, vector<768x512xbf16>, vector<2x512xf32> -> vector<2x512xf32>
    %c0_3 = arith.constant 0 : index
    %c0_4 = arith.constant 0 : index
    %4 = vector.load %arg3[%c0_3, %c0_4] : memref<1x512xf32, #tpu.memory_space<vmem>>, vector<1x512xf32>
    %5 = vector.broadcast %4 : vector<1x512xf32> to vector<2x512xf32>
    %6 = arith.addf %3, %5 : vector<2x512xf32>
    %cst_5 = arith.constant 0.000000e+00 : f32
    %7 = vector.broadcast %cst_5 : f32 to vector<2x512xf32>
    %8 = arith.maximumf %6, %7 : vector<2x512xf32>
    %c0_6 = arith.constant 0 : index
    %c0_7 = arith.constant 0 : index
    %9 = vector.load %arg4[%c0_6, %c0_7] : memref<1x512xf32, #tpu.memory_space<vmem>>, vector<1x512xf32>
    %10 = vector.broadcast %9 : vector<1x512xf32> to vector<2x512xf32>
    %11 = arith.mulf %8, %10 : vector<2x512xf32>
    %cst_8 = arith.constant dense<0.000000e+00> : vector<2xf32>
    %12 = vector.multi_reduction <add>, %11, %cst_8 [1] : vector<2x512xf32> to vector<2xf32>
    %13 = vector.shape_cast %12 : vector<2xf32> to vector<2x1xf32>
    %c0_9 = arith.constant 0 : index
    %c0_10 = arith.constant 0 : index
    %14 = vector.load %arg5[%c0_9, %c0_10] : memref<1x1xf32, #tpu.memory_space<vmem>>, vector<1x1xf32>
    %15 = vector.broadcast %14 : vector<1x1xf32> to vector<2x1xf32>
    %16 = arith.addf %13, %15 : vector<2x1xf32>
    %c0_11 = arith.constant 0 : index
    %c0_12 = arith.constant 0 : index
    %17 = vector.load %arg6[%c0_11, %c0_12] : memref<2x1xf32, #tpu.memory_space<vmem>>, vector<2x1xf32>
    tpu.vector_store %arg6[%c0_11, %c0_12], %16 {strides = array<i32>} : memref<2x1xf32, #tpu.memory_space<vmem>>, vector<2x1xf32>,
    return
  }
  func.func @transform_0(%arg0: i32) -> (i32, i32) {
    %c0_i32 = arith.constant 0 : i32
    %c0_i32_0 = arith.constant 0 : i32
    return %arg0, %c0_i32 : i32, i32
  }
  func.func @transform_1(%arg0: i32) -> (i32, i32) {
    %c0_i32 = arith.constant 0 : i32
    %c0_i32_0 = arith.constant 0 : i32
    %c0_i32_1 = arith.constant 0 : i32
    return %c0_i32, %c0_i32_0 : i32, i32
  }
  func.func @transform_2(%arg0: i32) -> (i32, i32) {
    %c0_i32 = arith.constant 0 : i32
    %c0_i32_0 = arith.constant 0 : i32
    %c0_i32_1 = arith.constant 0 : i32
    return %c0_i32, %c0_i32_0 : i32, i32
  }
  func.func @transform_3(%arg0: i32) -> (i32, i32) {
    %c0_i32 = arith.constant 0 : i32
    %c0_i32_0 = arith.constant 0 : i32
    %c0_i32_1 = arith.constant 0 : i32
    return %c0_i32, %c0_i32_0 : i32, i32
  }
  func.func @transform_4(%arg0: i32) -> (i32, i32) {
    %c0_i32 = arith.constant 0 : i32
    %c0_i32_0 = arith.constant 0 : i32
    %c0_i32_1 = arith.constant 0 : i32
    return %c0_i32, %c0_i32_0 : i32, i32
  }
  func.func @transform_5(%arg0: i32) -> (i32, i32) {
    %c0_i32 = arith.constant 0 : i32
    %c0_i32_0 = arith.constant 0 : i32
    return %arg0, %c0_i32 : i32, i32
  }
}

</mosaic_0001>

<bundles_post_ra>
// kernel: tpu_custom_call.1
= control target key start
LH: loop header
LB: loop body
LE: loop exit
PB: predicated region body
PF: predicated region fallthrough
CT: control target
= control target key end

     0   :  { %s2221_s0 = inlined_call_operand.hbm [shape: f32[2,6144], index: 0, kind: input, shape index: {}]   ;;  %s2222_s1 = inlined_call_operand.hbm [shape: bf16[768,512], index: 1, kind: input, shape index: {}]   ;;  %s2223_s2 = inlined_call_operand.vmem [shape: f32[1,512], index: 2, kind: input, shape index: {}]   ;;  %s2224_s3 = inlined_call_operand.vmem [shape: f32[1,512], index: 3, kind: input, shape index: {}]   ;;  %s2225_s4 = inlined_call_operand.<no memory space> [shape: f32[1,1], index: 4, kind: input, shape index: {}]   ;;  %s2226_s5 = inlined_call_operand.vmem [shape: f32[2,1], index: 5, kind: output, shape index: {}]  }
   0x1   :  { %v10_v0 = vstv %s2225_s4 }
   0x2   :  { %11 = vst [vmem:[#allocation2] sm:$0x1] %v10_v0 }
   0x3   :  { %12 = vsyncpa [#allocation4], 0 }
   0x4   :  { %13 = vsyncpa [#allocation6], 0  ;;  %s2121_s20 = smov [#allocation3]   ;;  %s2122_s22 = smov [#allocation5]  }
   0x5   :  { %s20_s21 = sshll.u32 %s2121_s20, 4  ;;  %s29_s23 = sshll.u32 %s2122_s22, 4  ;;  %s21_s21 = int_to_ptr.vmem [resolvable:$true] %s20_s21  ;;  %s2159_s23 = int_to_ptr.vmem [resolvable:$true] %s29_s23 }
   0x6   :  { %s2073_s26 = scalar_lea.hbm %s2221_s0, 192  ;;  %s2075_s30 = scalar_lea.hbm %s2221_s0, 1536 }
   0x7   :  { %p2074_p0 = scmp.ne.s32.totalorder %s2221_s0, %s2073_s26  ;;  %p2076_p1 = scmp.lt.u32.totalorder %s2075_s30, %s2073_s26 }
   0x8   :  { %p2077_p2 = scmp.lt.u32.totalorder %s2073_s26, %s2221_s0 }
   0xa   :  { %p2078_p3 = por %p2077_p2, %p2076_p1 }
   0xc   :  { %p2079_p4 = pnand %p2078_p3, %p2074_p0 }
   0xe   :  { %2082 = shalt.err (!%p2079_p4)
}
   0xf   :  { %s2083_s8 = scalar_lea.vmem %s21_s21, 192  ;;  %p2088_p6 = scmp.lt.s32.totalorder %s21_s21, %s21_s21 }
  0x10   :  { %p2084_p5 = scmp.ne.s32.totalorder %s21_s21, %s2083_s8  ;;  %p2089_p7 = scmp.lt.s32.totalorder %s2083_s8, %s2083_s8 }
  0x12   :  { %p2090_p8 = por %p2089_p7, %p2088_p6 }
  0x14   :  { %p2091_p9 = pnand %p2090_p8, %p2084_p5 }
  0x16   :  { %2094 = shalt.err (!%p2091_p9)
}
  0x17   :  { %23 = dma.hbm_to_vmem [thread:$0]  %s2221_s0, 192, %s21_s21, [#allocation4]  }
  0x18   :  { %s2095_s13 = scalar_lea.hbm %s2222_s1, 24576 }
  0x19   :  { %p2096_p10 = scmp.ne.s32.totalorder %s2222_s1, %s2095_s13  ;;  %p2099_p11 = scmp.lt.u32.totalorder %s2095_s13, %s2222_s1 }
  0x1b   :  { %p2101_p12 = pnand %p2099_p11, %p2096_p10 }
  0x1d   :  { %2104 = shalt.err (!%p2101_p12)
}
  0x1e   :  { %s2105_s18 = scalar_lea.vmem %s2159_s23, 24576  ;;  %p2110_p0 = scmp.lt.s32.totalorder %s2159_s23, %s2159_s23 }
  0x1f   :  { %p2106_p13 = scmp.ne.s32.totalorder %s2159_s23, %s2105_s18  ;;  %p2111_p1 = scmp.lt.s32.totalorder %s2105_s18, %s2105_s18 }
  0x21   :  { %p2112_p2 = por %p2111_p1, %p2110_p0 }
  0x23   :  { %p2113_p3 = pnand %p2112_p2, %p2106_p13 }
  0x25   :  { %2116 = shalt.err (!%p2113_p3)
}
  0x26   :  { %s2123_s0 = smov 256   ;;  %s2124_s19 = smov 16  }
  0x27   :  { %35 = dma.hbm_to_vmem [thread:$0]  %s2222_s1, 24576, %s2159_s23, [#allocation6], %s2123_s0, %s2123_s0, %s2124_s19  }
  0x28   :  { %2117 = dma.done.wait [#allocation4], 192  }
  0x29   :  { %2118 = vsyncadd [#allocation4], 4294967104 }
  0x2a   :  { %2119 = dma.done.wait [#allocation6], 24576  }
  0x2b   :  { %2120 = vsyncadd [#allocation6], 4294942720  ;;  %v1784_v1 = vld [vmem:[#allocation5 + $0x4] ss:$16 sps:$4 sm:$0xff]   ;;  %v1786_v2 = vld [vmem:[#allocation5 + $0xc] ss:$16 sps:$4 sm:$0xff]   ;;  %v56_v39 = vlaneseq }
  0x2c   :  { %1263 = vmatprep.subr.bf16.mxu0 %v1784_v1  ;;  %v1788_v3 = vld [vmem:[#allocation5] ss:$16 sps:$4 sm:$0xff]   ;;  %v1789_v4 = vld [vmem:[#allocation5 + $0x8] ss:$16 sps:$4 sm:$0xff]   ;;  %1386 = vmatprep.subr.bf16.mxu1 %v1786_v2  ;;  %v1790_v5 = vld [vmem:[#allocation5 + $0x24] ss:$16 sps:$4 sm:$0xff]  }
  0x2d   :  { %1264 = vmatpush1.bf16.msra.mxu0 %v1788_v3  ;;  %1387 = vmatpush1.bf16.msra.mxu1 %v1789_v4  ;;  %v1792_v6 = vld [vmem:[#allocation5 + $0x2c] ss:$16 sps:$4 sm:$0xff]   ;;  %v1794_v7 = vld [vmem:[#allocation5 + $0x20] ss:$16 sps:$4 sm:$0xff]   ;;  %v1795_v8 = vld [vmem:[#allocation5 + $0x28] ss:$16 sps:$4 sm:$0xff]  }
  0x2e   :  { %1265 = vmatprep.subr.bf16.mxu0 %v1790_v5  ;;  %1388 = vmatprep.subr.bf16.mxu1 %v1792_v6  ;;  %v1796_v9 = vld [vmem:[#allocation5 + $0x44] ss:$16 sps:$4 sm:$0xff]   ;;  %v1798_v10 = vld [vmem:[#allocation5 + $0x4c] ss:$16 sps:$4 sm:$0xff]   ;;  %v1800_v11 = vld [vmem:[#allocation5 + $0x40] ss:$16 sps:$4 sm:$0xff]  }
  0x2f   :  { %v1801_v12 = vld [vmem:[#allocation5 + $0x48] ss:$16 sps:$4 sm:$0xff]   ;;  %v1802_v13 = vld [vmem:[#allocation5 + $0x64] ss:$16 sps:$4 sm:$0xff]   ;;  %v1804_v14 = vld [vmem:[#allocation5 + $0x6c] ss:$16 sps:$4 sm:$0xff]  }
  0x30   :  { %v1806_v15 = vld [vmem:[#allocation5 + $0x60] ss:$16 sps:$4 sm:$0xff]   ;;  %v1807_v16 = vld [vmem:[#allocation5 + $0x68] ss:$16 sps:$4 sm:$0xff]   ;;  %v1808_v17 = vld [vmem:[#allocation5 + $0x84] ss:$16 sps:$4 sm:$0xff]  }
  0x31   :  { %1266 = vmatpush1.bf16.msra.mxu0 %v1794_v7  ;;  %1389 = vmatpush1.bf16.msra.mxu1 %v1795_v8  ;;  %v1810_v18 = vld [vmem:[#allocation5 + $0x8c] ss:$16 sps:$4 sm:$0xff]   ;;  %v1812_v19 = vld [vmem:[#allocation5 + $0x80] ss:$16 sps:$4 sm:$0xff]   ;;  %v1813_v20 = vld [vmem:[#allocation5 + $0x88] ss:$16 sps:$4 sm:$0xff]  }
  0x32   :  { %1267 = vmatprep.subr.bf16.mxu0 %v1796_v9  ;;  %1390 = vmatprep.subr.bf16.mxu1 %v1798_v10  ;;  %v1814_v21 = vld [vmem:[#allocation5 + $0xa4] ss:$16 sps:$4 sm:$0xff]   ;;  %v1816_v22 = vld [vmem:[#allocation5 + $0xac] ss:$16 sps:$4 sm:$0xff]   ;;  %v1818_v23 = vld [vmem:[#allocation5 + $0xa0] ss:$16 sps:$4 sm:$0xff]  }
  0x33   :  { %v1819_v24 = vld [vmem:[#allocation5 + $0xa8] ss:$16 sps:$4 sm:$0xff]   ;;  %v1820_v25 = vld [vmem:[#allocation5 + $0xc4] ss:$16 sps:$4 sm:$0xff]   ;;  %v1822_v26 = vld [vmem:[#allocation5 + $0xcc] ss:$16 sps:$4 sm:$0xff]  }
  0x34   :  { %v1824_v27 = vld [vmem:[#allocation5 + $0xc0] ss:$16 sps:$4 sm:$0xff]   ;;  %v1825_v28 = vld [vmem:[#allocation5 + $0xc8] ss:$16 sps:$4 sm:$0xff]   ;;  %v1826_v29 = vld [vmem:[#allocation5 + $0xe4] ss:$16 sps:$4 sm:$0xff]  }
  0x35   :  { %1268 = vmatpush1.bf16.msra.mxu0 %v1800_v11  ;;  %1391 = vmatpush1.bf16.msra.mxu1 %v1801_v12  ;;  %v1828_v30 = vld [vmem:[#allocation5 + $0xec] ss:$16 sps:$4 sm:$0xff]   ;;  %v1830_v31 = vld [vmem:[#allocation5 + $0xe0] ss:$16 sps:$4 sm:$0xff]   ;;  %v1831_v32 = vld [vmem:[#allocation5 + $0xe8] ss:$16 sps:$4 sm:$0xff]  }
  0x36   :  { %1269 = vmatprep.subr.bf16.mxu0 %v1802_v13  ;;  %1392 = vmatprep.subr.bf16.mxu1 %v1804_v14  ;;  %v1832_v33 = vld [vmem:[#allocation5 + $0x104] ss:$16 sps:$4 sm:$0xff]   ;;  %v1834_v34 = vld [vmem:[#allocation5 + $0x10c] ss:$16 sps:$4 sm:$0xff]   ;;  %v1836_v35 = vld [vmem:[#allocation5 + $0x100] ss:$16 sps:$4 sm:$0xff]  }
  0x37   :  { %v1837_v36 = vld [vmem:[#allocation5 + $0x108] ss:$16 sps:$4 sm:$0xff]   ;;  %v2125_v37 = vmov 1983009808   ;;  %v1838_v40 = vld [vmem:[#allocation5 + $0x124] ss:$16 sps:$4 sm:$0xff]  }
  0x38   :  { %v54_v38 = vunpack.c.l.s4 %v2125_v37  ;;  %v1840_v41 = vld [vmem:[#allocation5 + $0x12c] ss:$16 sps:$4 sm:$0xff]   ;;  %v1842_v42 = vld [vmem:[#allocation5 + $0x120] ss:$16 sps:$4 sm:$0xff]   ;;  %v2193_v44 = vshrl.u32 %v56_v39, 7  ;;  %v48_v53 = vld [vmem:[#allocation3] sm:$0xff] }
  0x39   :  { %1270 = vmatpush1.bf16.msra.mxu0 %v1806_v15  ;;  %1393 = vmatpush1.bf16.msra.mxu1 %v1807_v16  ;;  %v1843_v45 = vld [vmem:[#allocation5 + $0x128] ss:$16 sps:$4 sm:$0xff]   ;;  %v1844_v46 = vld [vmem:[#allocation5 + $0x144] ss:$16 sps:$4 sm:$0xff]   ;;  %v1846_v47 = vld [vmem:[#allocation5 + $0x14c] ss:$16 sps:$4 sm:$0xff]   ;;  %v52_v5 = vcombine.high %v48_v53, %v48_v53 }
  0x3a   :  { %1271 = vmatprep.subr.bf16.mxu0 %v1808_v17  ;;  %1394 = vmatprep.subr.bf16.mxu1 %v1810_v18  ;;  %v55_v43 = vunpack.c.0.s8 %v54_v38  ;;  %v1848_v48 = vld [vmem:[#allocation5 + $0x140] ss:$16 sps:$4 sm:$0xff]   ;;  %v1849_v49 = vld [vmem:[#allocation5 + $0x148] ss:$16 sps:$4 sm:$0xff]   ;;  %v1850_v51 = vld [vmem:[#allocation5 + $0x164] ss:$16 sps:$4 sm:$0xff]  }
  0x3b   :  { %v1852_v52 = vld [vmem:[#allocation5 + $0x16c] ss:$16 sps:$4 sm:$0xff]   ;;  %v1854_v54 = vld [vmem:[#allocation5 + $0x160] ss:$16 sps:$4 sm:$0xff]   ;;  %v1855_v56 = vld [vmem:[#allocation5 + $0x168] ss:$16 sps:$4 sm:$0xff]  }
  0x3c   :  { %v58_v50 = vsub.s32 %v55_v43, %v2193_v44  ;;  %v1856_v57 = vld [vmem:[#allocation5 + $0x184] ss:$16 sps:$4 sm:$0xff]   ;;  %v1858_v58 = vld [vmem:[#allocation5 + $0x18c] ss:$16 sps:$4 sm:$0xff]   ;;  %v1860_v60 = vld [vmem:[#allocation5 + $0x180] ss:$16 sps:$4 sm:$0xff]  }
  0x3d   :  { %1272 = vmatpush1.bf16.msra.mxu0 %v1812_v19  ;;  %1395 = vmatpush1.bf16.msra.mxu1 %v1813_v20  ;;  %v1861_v62 = vld [vmem:[#allocation5 + $0x188] ss:$16 sps:$4 sm:$0xff]   ;;  %v1862_v63 = vld [vmem:[#allocation5 + $0x1a4] ss:$16 sps:$4 sm:$0xff]   ;;  %v1864_v0 = vld [vmem:[#allocation5 + $0x1ac] ss:$16 sps:$4 sm:$0xff]  }
  0x3e   :  { %1273 = vmatprep.subr.bf16.mxu0 %v1814_v21  ;;  %1396 = vmatprep.subr.bf16.mxu1 %v1816_v22  ;;  %v59_v55 = vrot.slane %v48_v53, %v58_v50  ;;  %v1866_v1 = vld [vmem:[#allocation5 + $0x1a0] ss:$16 sps:$4 sm:$0xff]   ;;  %v1867_v2 = vld [vmem:[#allocation5 + $0x1a8] ss:$16 sps:$4 sm:$0xff]   ;;  %v1868_v3 = vld [vmem:[#allocation5 + $0x1c4] ss:$16 sps:$4 sm:$0xff]   ;;  %v2196_v10 = vrot.slane %v52_v5, %v58_v50 }
  0x3f   :  { %v1870_v4 = vld [vmem:[#allocation5 + $0x1cc] ss:$16 sps:$4 sm:$0xff]   ;;  %v1872_v6 = vld [vmem:[#allocation5 + $0x1c0] ss:$16 sps:$4 sm:$0xff]   ;;  %v1873_v7 = vld [vmem:[#allocation5 + $0x1c8] ss:$16 sps:$4 sm:$0xff]  }
  0x40   :  { %v67_v59 = vcombine.high %v59_v55, %v59_v55  ;;  %v1874_v8 = vld [vmem:[#allocation5 + $0x1e4] ss:$16 sps:$4 sm:$0xff]   ;;  %v1876_v9 = vld [vmem:[#allocation5 + $0x1ec] ss:$16 sps:$4 sm:$0xff]   ;;  %v1878_v11 = vld [vmem:[#allocation5 + $0x1e0] ss:$16 sps:$4 sm:$0xff]   ;;  %v68_v15 = vcombine.high %v2196_v10, %v2196_v10  ;;  %v83_v17 = vpack.c.bf16 %v59_v55, %v59_v55 }
  0x41   :  { %1274 = vmatpush1.bf16.msra.mxu0 %v1818_v23  ;;  %1397 = vmatpush1.bf16.msra.mxu1 %v1819_v24  ;;  %v1879_v12 = vld [vmem:[#allocation5 + $0x1e8] ss:$16 sps:$4 sm:$0xff]   ;;  %v1883_v13 = vld [vmem:[#allocation5 + $0x204] ss:$16 sps:$4 sm:$0xff]   ;;  %v1886_v14 = vld [vmem:[#allocation5 + $0x20c] ss:$16 sps:$4 sm:$0xff]  }
  0x42   :  { %1275 = vmatprep.subr.bf16.mxu0 %v1820_v25  ;;  %1398 = vmatprep.subr.bf16.mxu1 %v1822_v26  ;;  %v84_v61 = vpack.c.bf16 %v67_v59, %v67_v59  ;;  %v1881_v16 = vld [vmem:[#allocation5 + $0x200] ss:$16 sps:$4 sm:$0xff]   ;;  %v1884_v18 = vld [vmem:[#allocation5 + $0x208] ss:$16 sps:$4 sm:$0xff]   ;;  %v1889_v19 = vld [vmem:[#allocation5 + $0x224] ss:$16 sps:$4 sm:$0xff]   ;;  %v86_v21 = vpack.c.bf16 %v68_v15, %v68_v15 }
  0x43   :  { %v1892_v20 = vld [vmem:[#allocation5 + $0x22c] ss:$16 sps:$4 sm:$0xff]   ;;  %v1887_v22 = vld [vmem:[#allocation5 + $0x220] ss:$16 sps:$4 sm:$0xff]   ;;  %v1890_v23 = vld [vmem:[#allocation5 + $0x228] ss:$16 sps:$4 sm:$0xff]  }
  0x44   :  { %1295 = vmatprep.mubr.bf16.mxu0 %v84_v61  ;;  %1418 = vmatprep.mubr.bf16.mxu1 %v84_v61  ;;  %v1895_v24 = vld [vmem:[#allocation5 + $0x244] ss:$16 sps:$4 sm:$0xff]   ;;  %v1898_v25 = vld [vmem:[#allocation5 + $0x24c] ss:$16 sps:$4 sm:$0xff]   ;;  %v1893_v26 = vld [vmem:[#allocation5 + $0x240] ss:$16 sps:$4 sm:$0xff]  }
  0x45   :  { %1276 = vmatpush1.bf16.msra.mxu0 %v1824_v27  ;;  %1399 = vmatpush1.bf16.msra.mxu1 %v1825_v28  ;;  %v1896_v27 = vld [vmem:[#allocation5 + $0x248] ss:$16 sps:$4 sm:$0xff]   ;;  %v1901_v28 = vld [vmem:[#allocation5 + $0x264] ss:$16 sps:$4 sm:$0xff]   ;;  %v1916_v37 = vld [vmem:[#allocation5 + $0x2ac] ss:$16 sps:$4 sm:$0xff]  }
  0x46   :  { %1277 = vmatprep.subr.bf16.mxu0 %v1826_v29  ;;  %1400 = vmatprep.subr.bf16.mxu1 %v1828_v30  ;;  %v1904_v29 = vld [vmem:[#allocation5 + $0x26c] ss:$16 sps:$4 sm:$0xff]   ;;  %v1899_v30 = vld [vmem:[#allocation5 + $0x260] ss:$16 sps:$4 sm:$0xff]   ;;  %v1914_v39 = vld [vmem:[#allocation5 + $0x2a8] ss:$16 sps:$4 sm:$0xff]  }
  0x47   :  { %v1911_v38 = vld [vmem:[#allocation5 + $0x2a0] ss:$16 sps:$4 sm:$0xff]   ;;  %v1920_v43 = vld [vmem:[#allocation5 + $0x2c8] ss:$16 sps:$4 sm:$0xff]   ;;  %v1934_v50 = vld [vmem:[#allocation5 + $0x30c] ss:$16 sps:$4 sm:$0xff]  }
  0x48   :  { %v1937_v53 = vld [vmem:[#allocation5 + $0x324] ss:$16 sps:$4 sm:$0xff]   ;;  %v1935_v55 = vld [vmem:[#allocation5 + $0x320] ss:$16 sps:$4 sm:$0xff]   ;;  %v1976_v15 = vld [vmem:[#allocation5 + $0x3ec] ss:$16 sps:$4 sm:$0xff]  }
  0x49   :  { %1278 = vmatpush1.bf16.msra.mxu0 %v1830_v31  ;;  %1401 = vmatpush1.bf16.msra.mxu1 %v1831_v32  ;;  %v1902_v31 = vld [vmem:[#allocation5 + $0x268] ss:$16 sps:$4 sm:$0xff]   ;;  %v1907_v32 = vld [vmem:[#allocation5 + $0x284] ss:$16 sps:$4 sm:$0xff]   ;;  %v1941_v59 = vld [vmem:[#allocation5 + $0x340] ss:$16 sps:$4 sm:$0xff]  }
  0x4a   :  { %1279 = vmatprep.subr.bf16.mxu0 %v1832_v33  ;;  %1402 = vmatprep.subr.bf16.mxu1 %v1834_v34  ;;  %v1910_v33 = vld [vmem:[#allocation5 + $0x28c] ss:$16 sps:$4 sm:$0xff]   ;;  %v1905_v34 = vld [vmem:[#allocation5 + $0x280] ss:$16 sps:$4 sm:$0xff]   ;;  %v1949_v61 = vld [vmem:[#allocation5 + $0x364] ss:$16 sps:$4 sm:$0xff]  }
  0x4b   :  { %v1961_v5 = vld [vmem:[#allocation5 + $0x3a4] ss:$16 sps:$4 sm:$0xff]   ;;  %vm1539_vm0 = vcmask 1041408   ;;  %vm1557_vm1 = vcmask 1024  }
  0x4d   :  { %1280 = vmatpush1.bf16.msra.mxu0 %v1836_v35  ;;  %1403 = vmatpush1.bf16.msra.mxu1 %v1837_v36  ;;  %v1908_v35 = vld [vmem:[#allocation5 + $0x288] ss:$16 sps:$4 sm:$0xff]   ;;  %v1913_v36 = vld [vmem:[#allocation5 + $0x2a4] ss:$16 sps:$4 sm:$0xff]  }
  0x4e   :  { %1281 = vmatprep.subr.bf16.mxu0 %v1838_v40  ;;  %1404 = vmatprep.subr.bf16.mxu1 %v1840_v41  ;;  %v1919_v40 = vld [vmem:[#allocation5 + $0x2c4] ss:$16 sps:$4 sm:$0xff]   ;;  %v1922_v41 = vld [vmem:[#allocation5 + $0x2cc] ss:$16 sps:$4 sm:$0xff]  }
  0x51   :  { %1282 = vmatpush1.bf16.msra.mxu0 %v1842_v42  ;;  %1405 = vmatpush1.bf16.msra.mxu1 %v1843_v45  ;;  %v1917_v42 = vld [vmem:[#allocation5 + $0x2c0] ss:$16 sps:$4 sm:$0xff]   ;;  %v1925_v45 = vld [vmem:[#allocation5 + $0x2e4] ss:$16 sps:$4 sm:$0xff]  }
  0x52   :  { %1283 = vmatprep.subr.bf16.mxu0 %v1844_v46  ;;  %1406 = vmatprep.subr.bf16.mxu1 %v1846_v47  ;;  %v1928_v46 = vld [vmem:[#allocation5 + $0x2ec] ss:$16 sps:$4 sm:$0xff]   ;;  %v1923_v47 = vld [vmem:[#allocation5 + $0x2e0] ss:$16 sps:$4 sm:$0xff]  }
  0x55   :  { %1284 = vmatpush1.bf16.msra.mxu0 %v1848_v48  ;;  %1407 = vmatpush1.bf16.msra.mxu1 %v1849_v49  ;;  %v1926_v48 = vld [vmem:[#allocation5 + $0x2e8] ss:$16 sps:$4 sm:$0xff]   ;;  %v1931_v49 = vld [vmem:[#allocation5 + $0x304] ss:$16 sps:$4 sm:$0xff]  }
  0x56   :  { %1285 = vmatprep.subr.bf16.mxu0 %v1850_v51  ;;  %1408 = vmatprep.subr.bf16.mxu1 %v1852_v52  ;;  %v1929_v51 = vld [vmem:[#allocation5 + $0x300] ss:$16 sps:$4 sm:$0xff]   ;;  %v1932_v52 = vld [vmem:[#allocation5 + $0x308] ss:$16 sps:$4 sm:$0xff]  }
  0x59   :  { %1286 = vmatpush1.bf16.msra.mxu0 %v1854_v54  ;;  %1409 = vmatpush1.bf16.msra.mxu1 %v1855_v56  ;;  %v1940_v54 = vld [vmem:[#allocation5 + $0x32c] ss:$16 sps:$4 sm:$0xff]   ;;  %v1938_v56 = vld [vmem:[#allocation5 + $0x328] ss:$16 sps:$4 sm:$0xff]  }
  0x5a   :  { %1287 = vmatprep.subr.bf16.mxu0 %v1856_v57  ;;  %1410 = vmatprep.subr.bf16.mxu1 %v1858_v58  ;;  %v1943_v57 = vld [vmem:[#allocation5 + $0x344] ss:$16 sps:$4 sm:$0xff]   ;;  %v1946_v58 = vld [vmem:[#allocation5 + $0x34c] ss:$16 sps:$4 sm:$0xff]  }
  0x5d   :  { %1288 = vmatpush1.bf16.msra.mxu0 %v1860_v60  ;;  %1411 = vmatpush1.bf16.msra.mxu1 %v1861_v62  ;;  %v1944_v60 = vld [vmem:[#allocation5 + $0x348] ss:$16 sps:$4 sm:$0xff]   ;;  %v1952_v62 = vld [vmem:[#allocation5 + $0x36c] ss:$16 sps:$4 sm:$0xff]  }
  0x5e   :  { %1289 = vmatprep.subr.bf16.mxu0 %v1862_v63  ;;  %1412 = vmatprep.subr.bf16.mxu1 %v1864_v0  ;;  %v1947_v63 = vld [vmem:[#allocation5 + $0x360] ss:$16 sps:$4 sm:$0xff]   ;;  %v1950_v0 = vld [vmem:[#allocation5 + $0x368] ss:$16 sps:$4 sm:$0xff]  }
  0x61   :  { %1290 = vmatpush1.bf16.msra.mxu0 %v1866_v1  ;;  %1413 = vmatpush1.bf16.msra.mxu1 %v1867_v2  ;;  %v1955_v1 = vld [vmem:[#allocation5 + $0x384] ss:$16 sps:$4 sm:$0xff]   ;;  %v1958_v2 = vld [vmem:[#allocation5 + $0x38c] ss:$16 sps:$4 sm:$0xff]  }
  0x62   :  { %1291 = vmatprep.subr.bf16.mxu0 %v1868_v3  ;;  %1414 = vmatprep.subr.bf16.mxu1 %v1870_v4  ;;  %v1953_v3 = vld [vmem:[#allocation5 + $0x380] ss:$16 sps:$4 sm:$0xff]   ;;  %v1956_v4 = vld [vmem:[#allocation5 + $0x388] ss:$16 sps:$4 sm:$0xff]  }
  0x65   :  { %1292 = vmatpush1.bf16.msra.mxu0 %v1872_v6  ;;  %1415 = vmatpush1.bf16.msra.mxu1 %v1873_v7  ;;  %v1964_v6 = vld [vmem:[#allocation5 + $0x3ac] ss:$16 sps:$4 sm:$0xff]   ;;  %v1959_v7 = vld [vmem:[#allocation5 + $0x3a0] ss:$16 sps:$4 sm:$0xff]  }
  0x66   :  { %1293 = vmatprep.subr.bf16.mxu0 %v1874_v8  ;;  %1416 = vmatprep.subr.bf16.mxu1 %v1876_v9  ;;  %v1962_v8 = vld [vmem:[#allocation5 + $0x3a8] ss:$16 sps:$4 sm:$0xff]   ;;  %v1967_v9 = vld [vmem:[#allocation5 + $0x3c4] ss:$16 sps:$4 sm:$0xff]  }
  0x69   :  { %1294 = vmatpush1.bf16.msra.mxu0 %v1878_v11  ;;  %1417 = vmatpush1.bf16.msra.mxu1 %v1879_v12  ;;  %v1970_v11 = vld [vmem:[#allocation5 + $0x3cc] ss:$16 sps:$4 sm:$0xff]   ;;  %v1965_v12 = vld [vmem:[#allocation5 + $0x3c0] ss:$16 sps:$4 sm:$0xff]  }
  0x6a   :  { %1304 = vmatprep.subr.bf16.mxu0 %v1883_v13  ;;  %1427 = vmatprep.subr.bf16.mxu1 %v1886_v14  ;;  %v1968_v13 = vld [vmem:[#allocation5 + $0x3c8] ss:$16 sps:$4 sm:$0xff]   ;;  %v1973_v14 = vld [vmem:[#allocation5 + $0x3e4] ss:$16 sps:$4 sm:$0xff]  }
  0x6c   :  { %1296 = vmatmul.mubr.bf16.vlgmr.msra.gmra.mrb[0].mxu0 %v83_v17  ;;  %1419 = vmatmul.mubr.bf16.vlgmr.msra.gmra.mrb[0].mxu1 %v83_v17  ;;  %v1974_v17 = vld [vmem:[#allocation5 + $0x3e8] ss:$16 sps:$4 sm:$0xff]  }
  0x6d   :  { %1305 = vmatpush1.bf16.msra.mxu0 %v1881_v16  ;;  %1428 = vmatpush1.bf16.msra.mxu1 %v1884_v18  ;;  %v1971_v16 = vld [vmem:[#allocation5 + $0x3e0] ss:$16 sps:$4 sm:$0xff]   ;;  %v1979_v18 = vld [vmem:[#allocation5 + $0x404] ss:$16 sps:$4 sm:$0xff]  }
  0x6e   :  { %1306 = vmatprep.subr.bf16.mxu0 %v1889_v19  ;;  %1429 = vmatprep.subr.bf16.mxu1 %v1892_v20  ;;  %v1982_v19 = vld [vmem:[#allocation5 + $0x40c] ss:$16 sps:$4 sm:$0xff]   ;;  %v1977_v20 = vld [vmem:[#allocation5 + $0x400] ss:$16 sps:$4 sm:$0xff]  }
  0x6f   :  { %1336 = vmatprep.mubr.bf16.mxu0 %v86_v21  ;;  %1459 = vmatprep.mubr.bf16.mxu1 %v86_v21  ;;  %v85_v21 = vpack.c.bf16 %v2196_v10, %v2196_v10  ;;  %v1991_v10 = vld [vmem:[#allocation5 + $0x444] ss:$16 sps:$4 sm:$0xff]  }
  0x71   :  { %1307 = vmatpush1.bf16.msra.mxu0 %v1887_v22  ;;  %1430 = vmatpush1.bf16.msra.mxu1 %v1890_v23  ;;  %v1980_v22 = vld [vmem:[#allocation5 + $0x408] ss:$16 sps:$4 sm:$0xff]   ;;  %v2202_v23 = vld.sshfl [vmem:[#allocation3 + $0x8] sm:$0x33 pattern:$0x76325410] }
  0x72   :  { %1308 = vmatprep.subr.bf16.mxu0 %v1895_v24  ;;  %1431 = vmatprep.subr.bf16.mxu1 %v1898_v25  ;;  %v1985_v24 = vld [vmem:[#allocation5 + $0x424] ss:$16 sps:$4 sm:$0xff]   ;;  %v1988_v25 = vld [vmem:[#allocation5 + $0x42c] ss:$16 sps:$4 sm:$0xff]  }
  0x75   :  { %1309 = vmatpush1.bf16.msra.mxu0 %v1893_v26  ;;  %1432 = vmatpush1.bf16.msra.mxu1 %v1896_v27  ;;  %v76_v26 = vcombine.high %v2202_v23, %v2202_v23 }
  0x76   :  { %1310 = vmatprep.subr.bf16.mxu0 %v1901_v28  ;;  %1433 = vmatprep.subr.bf16.mxu1 %v1904_v29  ;;  %v1983_v28 = vld [vmem:[#allocation5 + $0x420] ss:$16 sps:$4 sm:$0xff]   ;;  %v1986_v29 = vld [vmem:[#allocation5 + $0x428] ss:$16 sps:$4 sm:$0xff]  }
  0x77   :  { %v88_v27 = vpack.c.bf16 %v76_v26, %v76_v26  ;;  %v293_v26 = vsub.s32 2, %v2193_v44 }
  0x79   :  { %1311 = vmatpush1.bf16.msra.mxu0 %v1899_v30  ;;  %1434 = vmatpush1.bf16.msra.mxu1 %v1902_v31  ;;  %v1994_v30 = vld [vmem:[#allocation5 + $0x44c] ss:$16 sps:$4 sm:$0xff]   ;;  %v1989_v31 = vld [vmem:[#allocation5 + $0x440] ss:$16 sps:$4 sm:$0xff]  }
  0x7a   :  { %1312 = vmatprep.subr.bf16.mxu0 %v1907_v32  ;;  %1435 = vmatprep.subr.bf16.mxu1 %v1910_v33  ;;  %v1992_v32 = vld [vmem:[#allocation5 + $0x448] ss:$16 sps:$4 sm:$0xff]   ;;  %v1997_v33 = vld [vmem:[#allocation5 + $0x464] ss:$16 sps:$4 sm:$0xff]  }
  0x7d   :  { %1313 = vmatpush1.bf16.msra.mxu0 %v1905_v34  ;;  %1436 = vmatpush1.bf16.msra.mxu1 %v1908_v35  ;;  %v2000_v34 = vld [vmem:[#allocation5 + $0x46c] ss:$16 sps:$4 sm:$0xff]   ;;  %v1995_v35 = vld [vmem:[#allocation5 + $0x460] ss:$16 sps:$4 sm:$0xff]  }
  0x7e   :  { %1314 = vmatprep.subr.bf16.mxu0 %v1913_v36  ;;  %1437 = vmatprep.subr.bf16.mxu1 %v1916_v37  ;;  %v1998_v36 = vld [vmem:[#allocation5 + $0x468] ss:$16 sps:$4 sm:$0xff]   ;;  %v2003_v37 = vld [vmem:[#allocation5 + $0x484] ss:$16 sps:$4 sm:$0xff]  }
  0x81   :  { %1315 = vmatpush1.bf16.msra.mxu0 %v1911_v38  ;;  %1438 = vmatpush1.bf16.msra.mxu1 %v1914_v39  ;;  %v2006_v38 = vld [vmem:[#allocation5 + $0x48c] ss:$16 sps:$4 sm:$0xff]   ;;  %v2001_v39 = vld [vmem:[#allocation5 + $0x480] ss:$16 sps:$4 sm:$0xff]  }
  0x82   :  { %1316 = vmatprep.subr.bf16.mxu0 %v1919_v40  ;;  %1439 = vmatprep.subr.bf16.mxu1 %v1922_v41  ;;  %v2004_v40 = vld [vmem:[#allocation5 + $0x488] ss:$16 sps:$4 sm:$0xff]   ;;  %v2009_v41 = vld [vmem:[#allocation5 + $0x4a4] ss:$16 sps:$4 sm:$0xff]  }
  0x85   :  { %1317 = vmatpush1.bf16.msra.mxu0 %v1917_v42  ;;  %1440 = vmatpush1.bf16.msra.mxu1 %v1920_v43  ;;  %v2012_v42 = vld [vmem:[#allocation5 + $0x4ac] ss:$16 sps:$4 sm:$0xff]   ;;  %v2007_v43 = vld [vmem:[#allocation5 + $0x4a0] ss:$16 sps:$4 sm:$0xff]  }
  0x86   :  { %1318 = vmatprep.subr.bf16.mxu0 %v1925_v45  ;;  %1441 = vmatprep.subr.bf16.mxu1 %v1928_v46  ;;  %v2010_v45 = vld [vmem:[#allocation5 + $0x4a8] ss:$16 sps:$4 sm:$0xff]   ;;  %v2015_v46 = vld [vmem:[#allocation5 + $0x4c4] ss:$16 sps:$4 sm:$0xff]  }
  0x89   :  { %1319 = vmatpush1.bf16.msra.mxu0 %v1923_v47  ;;  %1442 = vmatpush1.bf16.msra.mxu1 %v1926_v48  ;;  %v2018_v47 = vld [vmem:[#allocation5 + $0x4cc] ss:$16 sps:$4 sm:$0xff]   ;;  %v2013_v48 = vld [vmem:[#allocation5 + $0x4c0] ss:$16 sps:$4 sm:$0xff]  }
  0x8a   :  { %1320 = vmatprep.subr.bf16.mxu0 %v1931_v49  ;;  %1443 = vmatprep.subr.bf16.mxu1 %v1934_v50  ;;  %v2016_v49 = vld [vmem:[#allocation5 + $0x4c8] ss:$16 sps:$4 sm:$0xff]   ;;  %v2021_v50 = vld [vmem:[#allocation5 + $0x4e4] ss:$16 sps:$4 sm:$0xff]  }
  0x8d   :  { %1321 = vmatpush1.bf16.msra.mxu0 %v1929_v51  ;;  %1444 = vmatpush1.bf16.msra.mxu1 %v1932_v52  ;;  %v2024_v51 = vld [vmem:[#allocation5 + $0x4ec] ss:$16 sps:$4 sm:$0xff]   ;;  %v2019_v52 = vld [vmem:[#allocation5 + $0x4e0] ss:$16 sps:$4 sm:$0xff]  }
  0x8e   :  { %1322 = vmatprep.subr.bf16.mxu0 %v1937_v53  ;;  %1445 = vmatprep.subr.bf16.mxu1 %v1940_v54  ;;  %v2022_v53 = vld [vmem:[#allocation5 + $0x4e8] ss:$16 sps:$4 sm:$0xff]   ;;  %v2027_v54 = vld [vmem:[#allocation5 + $0x504] ss:$16 sps:$4 sm:$0xff]  }
  0x91   :  { %1323 = vmatpush1.bf16.msra.mxu0 %v1935_v55  ;;  %1446 = vmatpush1.bf16.msra.mxu1 %v1938_v56  ;;  %v2030_v55 = vld [vmem:[#allocation5 + $0x50c] ss:$16 sps:$4 sm:$0xff]   ;;  %v2025_v56 = vld [vmem:[#allocation5 + $0x500] ss:$16 sps:$4 sm:$0xff]  }
  0x92   :  { %1324 = vmatprep.subr.bf16.mxu0 %v1943_v57  ;;  %1447 = vmatprep.subr.bf16.mxu1 %v1946_v58  ;;  %v2028_v57 = vld [vmem:[#allocation5 + $0x508] ss:$16 sps:$4 sm:$0xff]   ;;  %v2033_v58 = vld [vmem:[#allocation5 + $0x524] ss:$16 sps:$4 sm:$0xff]  }
  0x95   :  { %1325 = vmatpush1.bf16.msra.mxu0 %v1941_v59  ;;  %1448 = vmatpush1.bf16.msra.mxu1 %v1944_v60  ;;  %v2036_v59 = vld [vmem:[#allocation5 + $0x52c] ss:$16 sps:$4 sm:$0xff]   ;;  %v2031_v60 = vld [vmem:[#allocation5 + $0x520] ss:$16 sps:$4 sm:$0xff]  }
  0x96   :  { %1326 = vmatprep.subr.bf16.mxu0 %v1949_v61  ;;  %1449 = vmatprep.subr.bf16.mxu1 %v1952_v62  ;;  %v2034_v61 = vld [vmem:[#allocation5 + $0x528] ss:$16 sps:$4 sm:$0xff]   ;;  %v2039_v62 = vld [vmem:[#allocation5 + $0x544] ss:$16 sps:$4 sm:$0xff]  }
  0x99   :  { %1327 = vmatpush1.bf16.msra.mxu0 %v1947_v63  ;;  %1450 = vmatpush1.bf16.msra.mxu1 %v1950_v0  ;;  %v2042_v63 = vld [vmem:[#allocation5 + $0x54c] ss:$16 sps:$4 sm:$0xff]   ;;  %v2037_v0 = vld [vmem:[#allocation5 + $0x540] ss:$16 sps:$4 sm:$0xff]  }
  0x9a   :  { %1328 = vmatprep.subr.bf16.mxu0 %v1955_v1  ;;  %1451 = vmatprep.subr.bf16.mxu1 %v1958_v2  ;;  %v2040_v1 = vld [vmem:[#allocation5 + $0x548] ss:$16 sps:$4 sm:$0xff]   ;;  %v2045_v2 = vld [vmem:[#allocation5 + $0x564] ss:$16 sps:$4 sm:$0xff]  }
  0x9d   :  { %1329 = vmatpush1.bf16.msra.mxu0 %v1953_v3  ;;  %1452 = vmatpush1.bf16.msra.mxu1 %v1956_v4  ;;  %v2048_v3 = vld [vmem:[#allocation5 + $0x56c] ss:$16 sps:$4 sm:$0xff]   ;;  %v2043_v4 = vld [vmem:[#allocation5 + $0x560] ss:$16 sps:$4 sm:$0xff]  }
  0x9e   :  { %1330 = vmatprep.subr.bf16.mxu0 %v1961_v5  ;;  %1453 = vmatprep.subr.bf16.mxu1 %v1964_v6  ;;  %v2046_v5 = vld [vmem:[#allocation5 + $0x568] ss:$16 sps:$4 sm:$0xff]   ;;  %v2051_v6 = vld [vmem:[#allocation5 + $0x584] ss:$16 sps:$4 sm:$0xff]  }
  0xa1   :  { %1331 = vmatpush1.bf16.msra.mxu0 %v1959_v7  ;;  %1454 = vmatpush1.bf16.msra.mxu1 %v1962_v8  ;;  %v2054_v7 = vld [vmem:[#allocation5 + $0x58c] ss:$16 sps:$4 sm:$0xff]   ;;  %v2049_v8 = vld [vmem:[#allocation5 + $0x580] ss:$16 sps:$4 sm:$0xff]  }
  0xa2   :  { %1332 = vmatprep.subr.bf16.mxu0 %v1967_v9  ;;  %1455 = vmatprep.subr.bf16.mxu1 %v1970_v11  ;;  %v2052_v9 = vld [vmem:[#allocation5 + $0x588] ss:$16 sps:$4 sm:$0xff]   ;;  %v2057_v11 = vld [vmem:[#allocation5 + $0x5a4] ss:$16 sps:$4 sm:$0xff]  }
  0xa5   :  { %1333 = vmatpush1.bf16.msra.mxu0 %v1965_v12  ;;  %1456 = vmatpush1.bf16.msra.mxu1 %v1968_v13  ;;  %v2060_v12 = vld [vmem:[#allocation5 + $0x5ac] ss:$16 sps:$4 sm:$0xff]   ;;  %v2055_v13 = vld [vmem:[#allocation5 + $0x5a0] ss:$16 sps:$4 sm:$0xff]  }
  0xa6   :  { %1334 = vmatprep.subr.bf16.mxu0 %v1973_v14  ;;  %1457 = vmatprep.subr.bf16.mxu1 %v1976_v15  ;;  %v2058_v14 = vld [vmem:[#allocation5 + $0x5a8] ss:$16 sps:$4 sm:$0xff]   ;;  %v2063_v15 = vld [vmem:[#allocation5 + $0x5c4] ss:$16 sps:$4 sm:$0xff]  }
  0xa9   :  { %1335 = vmatpush1.bf16.msra.mxu0 %v1971_v16  ;;  %1458 = vmatpush1.bf16.msra.mxu1 %v1974_v17  ;;  %v2066_v16 = vld [vmem:[#allocation5 + $0x5cc] ss:$16 sps:$4 sm:$0xff]   ;;  %v2061_v17 = vld [vmem:[#allocation5 + $0x5c0] ss:$16 sps:$4 sm:$0xff]  }
  0xaa   :  { %1345 = vmatprep.subr.bf16.mxu0 %v1979_v18  ;;  %1468 = vmatprep.subr.bf16.mxu1 %v1982_v19  ;;  %v2064_v18 = vld [vmem:[#allocation5 + $0x5c8] ss:$16 sps:$4 sm:$0xff]   ;;  %v2069_v19 = vld [vmem:[#allocation5 + $0x5e4] ss:$16 sps:$4 sm:$0xff]  }
  0xac   :  { %1337 = vmatmul.mubr.bf16.vlgmr.msra.gmra.mrb[0].mxu0 %v85_v21  ;;  %1460 = vmatmul.mubr.bf16.vlgmr.msra.gmra.mrb[0].mxu1 %v85_v21  ;;  %v2067_v21 = vld [vmem:[#allocation5 + $0x5e0] ss:$16 sps:$4 sm:$0xff]  }
  0xad   :  { %1346 = vmatpush1.bf16.msra.mxu0 %v1977_v20  ;;  %1469 = vmatpush1.bf16.msra.mxu1 %v1980_v22  ;;  %v2072_v20 = vld [vmem:[#allocation5 + $0x5ec] ss:$16 sps:$4 sm:$0xff]   ;;  %v2070_v22 = vld [vmem:[#allocation5 + $0x5e8] ss:$16 sps:$4 sm:$0xff]  }
  0xae   :  { %1347 = vmatprep.subr.bf16.mxu0 %v1985_v24  ;;  %1470 = vmatprep.subr.bf16.mxu1 %v1988_v25  ;;  %v87_v24 = vpack.c.bf16 %v2202_v23, %v2202_v23  ;;  %v285_v25 = vsub.s32 0, %v2193_v44  ;;  %v1513_v23 = vld [vmem:[%s2224_s3] sm:$0xf] }
  0xaf   :  { %1377 = vmatprep.mubr.bf16.mxu0 %v88_v27  ;;  %1500 = vmatprep.mubr.bf16.mxu1 %v88_v27  ;;  %v281_v27 = vld [vmem:[%s2223_s2] sm:$0xf] }
  0xb1   :  { %1348 = vmatpush1.bf16.msra.mxu0 %v1983_v28  ;;  %1471 = vmatpush1.bf16.msra.mxu1 %v1986_v29  ;;  %v289_v28 = vsub.s32 1, %v2193_v44  ;;  %v297_v29 = vsub.s32 3, %v2193_v44 }
  0xb2   :  { %1349 = vmatprep.subr.bf16.mxu0 %v1991_v10  ;;  %1472 = vmatprep.subr.bf16.mxu1 %v1994_v30  ;;  %v286_v10 = vrot.slane %v281_v27, %v285_v25  ;;  %v294_v30 = vrot.slane %v281_v27, %v293_v26 }
  0xb5   :  { %1350 = vmatpush1.bf16.msra.mxu0 %v1989_v31  ;;  %1473 = vmatpush1.bf16.msra.mxu1 %v1992_v32  ;;  %v290_v31 = vrot.slane %v281_v27, %v289_v28  ;;  %v298_v32 = vrot.slane %v281_v27, %v297_v29 }
  0xb6   :  { %1351 = vmatprep.subr.bf16.mxu0 %v1997_v33  ;;  %1474 = vmatprep.subr.bf16.mxu1 %v2000_v34 }
  0xb9   :  { %1352 = vmatpush1.bf16.msra.mxu0 %v1995_v35  ;;  %1475 = vmatpush1.bf16.msra.mxu1 %v1998_v36  ;;  %v1518_v36 = vrot.slane %v1513_v23, %v285_v25 }
  0xba   :  { %1353 = vmatprep.subr.bf16.mxu0 %v2003_v37  ;;  %1476 = vmatprep.subr.bf16.mxu1 %v2006_v38 }
  0xbd   :  { %1354 = vmatpush1.bf16.msra.mxu0 %v2001_v39  ;;  %1477 = vmatpush1.bf16.msra.mxu1 %v2004_v40  ;;  %v1526_v40 = vrot.slane %v1513_v23, %v293_v26 }
  0xbe   :  { %1355 = vmatprep.subr.bf16.mxu0 %v2009_v41  ;;  %1478 = vmatprep.subr.bf16.mxu1 %v2012_v42  ;;  %v1522_v42 = vrot.slane %v1513_v23, %v289_v28 }
  0xc1   :  { %1356 = vmatpush1.bf16.msra.mxu0 %v2007_v43  ;;  %1479 = vmatpush1.bf16.msra.mxu1 %v2010_v45 }
  0xc2   :  { %1357 = vmatprep.subr.bf16.mxu0 %v2015_v46  ;;  %1480 = vmatprep.subr.bf16.mxu1 %v2018_v47 }
  0xc5   :  { %1358 = vmatpush1.bf16.msra.mxu0 %v2013_v48  ;;  %1481 = vmatpush1.bf16.msra.mxu1 %v2016_v49 }
  0xc6   :  { %1359 = vmatprep.subr.bf16.mxu0 %v2021_v50  ;;  %1482 = vmatprep.subr.bf16.mxu1 %v2024_v51 }
  0xc9   :  { %1360 = vmatpush1.bf16.msra.mxu0 %v2019_v52  ;;  %1483 = vmatpush1.bf16.msra.mxu1 %v2022_v53  ;;  %v1530_v52 = vrot.slane %v1513_v23, %v297_v29 }
  0xca   :  { %1361 = vmatprep.subr.bf16.mxu0 %v2027_v54  ;;  %1484 = vmatprep.subr.bf16.mxu1 %v2030_v55 }
  0xcd   :  { %1362 = vmatpush1.bf16.msra.mxu0 %v2025_v56  ;;  %1485 = vmatpush1.bf16.msra.mxu1 %v2028_v57 }
  0xce   :  { %1363 = vmatprep.subr.bf16.mxu0 %v2033_v58  ;;  %1486 = vmatprep.subr.bf16.mxu1 %v2036_v59 }
  0xd1   :  { %1364 = vmatpush1.bf16.msra.mxu0 %v2031_v60  ;;  %1487 = vmatpush1.bf16.msra.mxu1 %v2034_v61 }
  0xd2   :  { %1365 = vmatprep.subr.bf16.mxu0 %v2039_v62  ;;  %1488 = vmatprep.subr.bf16.mxu1 %v2042_v63 }
  0xd5   :  { %1366 = vmatpush1.bf16.msra.mxu0 %v2037_v0  ;;  %1489 = vmatpush1.bf16.msra.mxu1 %v2040_v1  ;;  %v1758_v0 = vld [vmem:[#allocation2] ss:$0 sm:$0xff] }
  0xd6   :  { %1367 = vmatprep.subr.bf16.mxu0 %v2045_v2  ;;  %1490 = vmatprep.subr.bf16.mxu1 %v2048_v3 }
  0xd9   :  { %1368 = vmatpush1.bf16.msra.mxu0 %v2043_v4  ;;  %1491 = vmatpush1.bf16.msra.mxu1 %v2046_v5 }
  0xda   :  { %1369 = vmatprep.subr.bf16.mxu0 %v2051_v6  ;;  %1492 = vmatprep.subr.bf16.mxu1 %v2054_v7 }
  0xdd   :  { %1370 = vmatpush1.bf16.msra.mxu0 %v2049_v8  ;;  %1493 = vmatpush1.bf16.msra.mxu1 %v2052_v9 }
  0xde   :  { %1371 = vmatprep.subr.bf16.mxu0 %v2057_v11  ;;  %1494 = vmatprep.subr.bf16.mxu1 %v2060_v12 }
  0xe1   :  { %1372 = vmatpush1.bf16.msra.mxu0 %v2055_v13  ;;  %1495 = vmatpush1.bf16.msra.mxu1 %v2058_v14 }
  0xe2   :  { %1373 = vmatprep.subr.bf16.mxu0 %v2063_v15  ;;  %1496 = vmatprep.subr.bf16.mxu1 %v2066_v16 }
  0xe5   :  { %1374 = vmatpush1.bf16.msra.mxu0 %v2061_v17  ;;  %1497 = vmatpush1.bf16.msra.mxu1 %v2064_v18 }
  0xe6   :  { %1375 = vmatprep.subr.bf16.mxu0 %v2069_v19  ;;  %1498 = vmatprep.subr.bf16.mxu1 %v2072_v20 }
  0xe9   :  { %1376 = vmatpush1.bf16.msra.mxu0 %v2067_v21  ;;  %1499 = vmatpush1.bf16.msra.mxu1 %v2070_v22 }
  0xec   :  { %1378 = vmatmul.mubr.bf16.vlgmr.msra.gmra.mrb[0].mxu0 %v87_v24  ;;  %1501 = vmatmul.mubr.bf16.vlgmr.msra.gmra.mrb[0].mxu1 %v87_v24 }
 0x1bf   :  { %v1379_v33 = vpop.f32.mrb[0].mxu0  ;;  %v1502_v34 = vpop.f32.mrb[0].mxu1 }
 0x1c0   :  { %v1759_v35 = vadd.f32 %v1379_v33, %v286_v10  ;;  %v1761_v37 = vadd.f32 %v1502_v34, %v294_v30  ;;  %v1381_v38 = vpop.f32.mrb[1].mxu0  ;;  %v1504_v39 = vpop.f32.mrb[1].mxu1 }
 0x1c1   :  { %v1760_v41 = vadd.f32 %v1381_v38, %v290_v31  ;;  %v1762_v43 = vadd.f32 %v1504_v39, %v298_v32  ;;  %v1383_v44 = vpop.f32.mrb[2].mxu0  ;;  %v1506_v45 = vpop.f32.mrb[2].mxu1 }
 0x1c2   :  { %v1509_v46 = vmax.f32 %v1759_v35, 0.0  ;;  %v1511_v47 = vmax.f32 %v1761_v37, 0.0  ;;  %v1384_v48 = vpop.f32.mrb[3].mxu0  ;;  %v1507_v49 = vpop.f32.mrb[3].mxu1 }
 0x1c3   :  { %v1510_v50 = vmax.f32 %v1760_v41, 0.0  ;;  %v1512_v51 = vmax.f32 %v1762_v43, 0.0 }
 0x1c4   :  { %v1535_v53 = vmul.f32 %v1518_v36, %v1509_v46  ;;  %v1537_v54 = vmul.f32 %v1526_v40, %v1511_v47 }
 0x1c5   :  { %v1536_v55 = vmul.f32 %v1522_v42, %v1510_v50  ;;  %v1538_v57 = vmul.f32 %v1530_v52, %v1512_v51 }
 0x1c6   :  { %v1540_v56 = vsel %vm1539_vm0, %v1535_v53, 0.0  ;;  %v1543_v60 = vsel %vm1539_vm0, %v1537_v54, 0.0 }
 0x1c7   :  { %v1541_v58 = vsel %vm1539_vm0, %v1536_v55, 0.0  ;;  %v1545_v62 = vsel %vm1539_vm0, %v1538_v57, 0.0 }
 0x1c8   :  { %v1542_v59 = vadd.f32 %v1541_v58, %v1540_v56 }
 0x1ca   :  { %v1544_v61 = vadd.f32 %v1543_v60, %v1542_v59 }
 0x1cc   :  { %v1546_v63 = vadd.f32 %v1545_v62, %v1544_v61 }
 0x1ce   :  { %1547 = vadd.xlane.f32.xlu0 %v1546_v63 }
 0x25b   :  { %v1548_v1 = vpop.xlane.xlu0 %1547 }
 0x25c   :  { %v1556_v2 = vadd.f32 %v1758_v0, %v1548_v1 }
 0x25e   :  { %1558 = vst.msk [vmem:[%s2226_s5] sm:$0x3] %vm1557_vm1, %v1556_v2 }
 0x25f   :  { %1563 = vsyncpa [#allocation4], 1 }
 0x260   :  { %1564 = vsyncpa [#allocation6], 1 }

</bundles_post_ra>
